<compile_context>
chip_gen: v7x
topology: tpu7x:2x2x1
jax: 0.10.0
libtpu: 0.0.40
codegen_flags: <defaults>
</compile_context>

<pallas_src>
import functools

import jax
import jax.numpy as jnp
import numpy as np
from jax.experimental import pallas as pl
from jax.experimental.pallas import tpu as pltpu

ALPHA = 0.3


def _round_up(x, m):
    return (x + m - 1) // m * m


def _dotprod_nb_kernel(idx_ref, ctab_ref, out_ref):
    """One (batch-tile, vocab-tile) grid step.

    idx_ref : (S, TB)  int32   -- seq-major indices for TB batch rows
    ctab_ref: (1, TV)  float32 -- fused-table slab for this vocab tile
    out_ref : (1, TB)  float32 -- per-row sums, accumulated over vocab tiles
    """
    v_step = pl.program_id(1)
    s_len, tb = idx_ref.shape
    tv = ctab_ref.shape[1]

    @pl.when(v_step == 0)
    def _init():
        out_ref[...] = jnp.zeros_like(out_ref)

    idx_t = idx_ref[...]                                             # (S, TB)
    v_base = v_step * tv

    # Lane-dense one-hot counts over this vocab window:
    #   count[v, b] = #{s : idx[b, s] == v_base + v}
    vocab_ids = jax.lax.broadcasted_iota(jnp.int32, (s_len, tv, tb), 1) + v_base
    hits = (vocab_ids == idx_t[:, None, :]).astype(jnp.float32)      # (S, TV, TB)
    count = jnp.sum(hits, axis=0)                                    # (TV, TB)

    # Contract the vocab axis against the fused table on the MXU -> (1, TB),
    # accumulated into the (vocab-resident) output block.
    out_ref[...] += jnp.dot(ctab_ref[...], count,
                            preferred_element_type=jnp.float32)


@functools.partial(jax.jit, static_argnames=("tb", "tv"))
def dotprod_nb_forward(feat_idx, w_weight, r_weight, rn_weight, fc_weight,
                       alpha=ALPHA, *, tb=128, tv=512):
    """feat_idx: (B, S) int; embedding tables (V+1, 1) f32; fc_weight (2, 2) f32."""
    B, S = feat_idx.shape
    V1 = w_weight.shape[0]

    # Fuse the three width-1 embedding tables + the +0.4 / alpha combine into
    # one table row: c[v] = (w[v] + 0.4) * ((1-a)*r[v] + a*rn[v]).
    c = (w_weight[:, 0] + 0.4) * ((1.0 - alpha) * r_weight[:, 0]
                                  + alpha * rn_weight[:, 0])          # (V1,)

    tv_eff = min(tv, _round_up(V1, 128))          # vocab tile (multiple of 128)
    vp = _round_up(V1, tv_eff)                    # padded vocab extent
    ctab = jnp.zeros((1, vp), jnp.float32).at[0, :V1].set(c.astype(jnp.float32))

    b_pad = _round_up(B, tb)                      # pad batch to lane-dense tiles
    idx_pad = jnp.zeros((b_pad, S), jnp.int32).at[:B].set(feat_idx.astype(jnp.int32))
    idx_t = idx_pad.T                             # (S, b_pad) seq-major, batch on lanes

    grid = (b_pad // tb, vp // tv_eff)            # reduction (vocab) axis last
    s_tiles = pl.pallas_call(
        _dotprod_nb_kernel,
        out_shape=jax.ShapeDtypeStruct((grid[0], tb), jnp.float32),
        grid=grid,
        in_specs=[
            pl.BlockSpec((S, tb), lambda b, v: (0, b)),        # indices (seq-major)
            pl.BlockSpec((1, tv_eff), lambda b, v: (0, v)),    # fused table slab
        ],
        out_specs=pl.BlockSpec((1, tb), lambda b, v: (b, 0)),  # resident over vocab axis
        compiler_params=pltpu.CompilerParams(
            dimension_semantics=("parallel", "arbitrary")),
    )(idx_t, ctab)

    s = s_tiles.reshape(-1)[:B]                                # (B,) drop batch padding
    x = jnp.stack([s, -s], axis=-1)                            # == (w * r).sum(1)
    return x @ fc_weight.T                                     # fc: Linear(2,2,no bias)


def make_params(vocab_size, key):
    """Deterministic parameter init mirroring DotProdNB.__init__ shapes."""
    k_w, k_r, k_rn = jax.random.split(key, 3)
    V1 = vocab_size + 1
    # w: Embedding(V+1, 1, padding_idx=0), uniform(-0.1, 0.1), row 0 zeroed
    w_weight = jax.random.uniform(k_w, (V1, 1), jnp.float32, -0.1, 0.1)
    w_weight = w_weight.at[0].set(0.0)
    # r: Embedding(V+1, 1), frozen (naive-bayes log-count-ratio stand-in)
    r_weight = jax.random.normal(k_r, (V1, 1), jnp.float32)
    # r_noise: Embedding(V+1, 1, padding_idx=0), frozen, row 0 zeroed
    rn_weight = jax.random.normal(k_rn, (V1, 1), jnp.float32)
    rn_weight = rn_weight.at[0].set(0.0)
    # fc: Linear(2, 2, bias=False) with weight = eye(2)
    fc_weight = jnp.eye(2, dtype=jnp.float32)
    return w_weight, r_weight, rn_weight, fc_weight


def reference_forward(feat_idx, w_weight, r_weight, rn_weight, fc_weight,
                      alpha=ALPHA):
    w = w_weight[feat_idx] + 0.4                                # (B, S, 1)
    r = r_weight[feat_idx] * (1.0 - alpha) + rn_weight[feat_idx] * alpha
    r = jnp.concatenate([r, -r], axis=-1)                       # (B, S, 2)
    x = (w * r).sum(axis=1)                                     # (B, 2)
    return x @ fc_weight.T


if __name__ == "__main__":
    B, S = 2, 8
    vocab_size = 30

    key = jax.random.PRNGKey(0)
    k_params, k_idx = jax.random.split(key)
    w_w, r_w, rn_w, fc_w = make_params(vocab_size, k_params)

    feat_idx = jax.random.randint(k_idx, (B, S), 0, vocab_size + 1, dtype=jnp.int32)

    out = dotprod_nb_forward(feat_idx, w_w, r_w, rn_w, fc_w)
    out = jax.block_until_ready(out)

    ref = reference_forward(feat_idx, w_w, r_w, rn_w, fc_w)
    np.testing.assert_allclose(np.asarray(out), np.asarray(ref), rtol=1e-5, atol=1e-5)

    print("KERNEL_OK")
</pallas_src>

<mosaic_0001>
module attributes {stable_mosaic.version = 11 : i64} {
  func.func @_dotprod_nb_kernel(%arg0: i32, %arg1: i32, %arg2: memref<8x128xi32, #tpu.memory_space<vmem>>, %arg3: memref<1x128xf32, #tpu.memory_space<vmem>>, %arg4: memref<1x128xf32, #tpu.memory_space<vmem>>) attributes {dimension_semantics = [#tpu.dimension_semantics<parallel>, #tpu.dimension_semantics<arbitrary>], iteration_bounds = array<i64: 1, 1>, scalar_prefetch = 0 : i64, scratch_operands = 0 : i64, tpu.core_type = #tpu.core_type<tc>, window_params = [{transform_indices = @transform_0, window_bounds = array<i64: 8, 128>}, {transform_indices = @transform_1, window_bounds = array<i64: 1, 128>}, {transform_indices = @transform_2, window_bounds = array<i64: 1, 128>}]} {
    %c0_i32 = arith.constant 0 : i32
    %0 = arith.cmpi eq, %arg1, %c0_i32 : i32
    %1 = arith.extui %0 : i1 to i32
    %c0_i32_0 = arith.constant 0 : i32
    %2 = arith.cmpi ne, %1, %c0_i32_0 : i32
    scf.if %2 {
      %cst_9 = arith.constant 0.000000e+00 : f32
      %19 = vector.broadcast %cst_9 : f32 to vector<1x128xf32>
      %c0_10 = arith.constant 0 : index
      %c0_11 = arith.constant 0 : index
      %20 = vector.load %arg4[%c0_10, %c0_11] : memref<1x128xf32, #tpu.memory_space<vmem>>, vector<1x128xf32>
      tpu.vector_store %arg4[%c0_10, %c0_11], %19 {strides = array<i32>} : memref<1x128xf32, #tpu.memory_space<vmem>>, vector<1x128xf32>,
    } else {
    }
    %c0 = arith.constant 0 : index
    %c0_1 = arith.constant 0 : index
    %3 = vector.load %arg2[%c0, %c0_1] : memref<8x128xi32, #tpu.memory_space<vmem>>, vector<8x128xi32>
    %c128_i32 = arith.constant 128 : i32
    %4 = arith.muli %arg1, %c128_i32 : i32
    %5 = tpu.iota {dimensions = array<i32: 1>} : vector<8x128x128xi32>
    %6 = vector.broadcast %4 : i32 to vector<8x128x128xi32>
    %7 = arith.addi %5, %6 : vector<8x128x128xi32>
    %8 = vector.shape_cast %3 : vector<8x128xi32> to vector<8x1x128xi32>
    %9 = vector.broadcast %8 : vector<8x1x128xi32> to vector<8x128x128xi32>
    %10 = arith.cmpi eq, %7, %9 : vector<8x128x128xi32>
    %11 = arith.extui %10 : vector<8x128x128xi1> to vector<8x128x128xi32>
    %12 = arith.sitofp %11 : vector<8x128x128xi32> to vector<8x128x128xf32>
    %cst = arith.constant dense<0.000000e+00> : vector<128x128xf32>
    %13 = vector.multi_reduction <add>, %12, %cst [0] : vector<8x128x128xf32> to vector<128x128xf32>
    %c0_2 = arith.constant 0 : index
    %c0_3 = arith.constant 0 : index
    %14 = vector.load %arg4[%c0_2, %c0_3] : memref<1x128xf32, #tpu.memory_space<vmem>>, vector<1x128xf32>
    %c0_4 = arith.constant 0 : index
    %c0_5 = arith.constant 0 : index
    %15 = vector.load %arg3[%c0_4, %c0_5] : memref<1x128xf32, #tpu.memory_space<vmem>>, vector<1x128xf32>
    %cst_6 = arith.constant dense<0.000000e+00> : vector<1x128xf32>
    %16 = tpu.matmul %15, %13, %cst_6 {dimension_numbers = #tpu.dot_dimension_numbers<[1], [0], [0], [1], [0, 0, 1, 1], [], []>} : vector<1x128xf32>, vector<128x128xf32>, vector<1x128xf32> -> vector<1x128xf32>
    %17 = arith.addf %14, %16 : vector<1x128xf32>
    %c0_7 = arith.constant 0 : index
    %c0_8 = arith.constant 0 : index
    %18 = vector.load %arg4[%c0_7, %c0_8] : memref<1x128xf32, #tpu.memory_space<vmem>>, vector<1x128xf32>
    tpu.vector_store %arg4[%c0_7, %c0_8], %17 {strides = array<i32>} : memref<1x128xf32, #tpu.memory_space<vmem>>, vector<1x128xf32>,
    return
  }
  func.func @transform_0(%arg0: i32, %arg1: i32) -> (i32, i32) {
    %c0_i32 = arith.constant 0 : i32
    %c0_i32_0 = arith.constant 0 : i32
    return %c0_i32, %arg0 : i32, i32
  }
  func.func @transform_1(%arg0: i32, %arg1: i32) -> (i32, i32) {
    %c0_i32 = arith.constant 0 : i32
    %c0_i32_0 = arith.constant 0 : i32
    return %c0_i32, %arg1 : i32, i32
  }
  func.func @transform_2(%arg0: i32, %arg1: i32) -> (i32, i32) {
    %c0_i32 = arith.constant 0 : i32
    %c0_i32_0 = arith.constant 0 : i32
    return %arg0, %c0_i32 : i32, i32
  }
}

</mosaic_0001>

<bundles_post_ra>
// kernel: dotprod_nb_forward.1
= control target key start
LH: loop header
LB: loop body
LE: loop exit
PB: predicated region body
PF: predicated region fallthrough
CT: control target
= control target key end

     0   :  { %v18_v0 = vlaneseq  ;;  %v916_v1 = vmov 0.0|0.0   ;;  %v917_v2 = vmov 1966171168   ;;  %v918_v4 = vmov 0.0   ;;  %s1517_s0 = inlined_call_operand.vmem [shape: s32[8,128], index: 0, kind: input, shape index: {}]   ;;  %s1518_s2 = inlined_call_operand.vmem [shape: f32[1,128], index: 2, kind: output, shape index: {}]   ;;  %s1519_s1 = inlined_call_operand.vmem [shape: f32[1,128], index: 1, kind: input, shape index: {}]  }
   0x1   :  { %887 = vmatprep.subr.bf16.mxu0 %v916_v1  ;;  %v54_v3 = vunpack.c.l.s4 %v917_v2  ;;  %15 = vst [vmem:[%s1518_s2] sm:$0x1] %v918_v4  ;;  %v16_v5 = vld [vmem:[%s1517_s0] sm:$0xff]  ;;  %vm919_vm0 = vmmov 0  }
   0x2   :  { %v943_v6 = vshrl.u32 %v18_v0, 7  ;;  %884 = vmatprep.mubr.msk.f32.mxu0 %vm919_vm0, %v918_v4  ;;  %v52_v7 = vcombine.high %v16_v5, %v16_v5 }
   0x3   :  { %v55_v8 = vunpack.c.0.s8 %v54_v3 }
   0x4   :  { %v103_v12 = vsub.s32 0, %v943_v6  ;;  %v949_v18 = vadd.s32 8, %v943_v6  ;;  %v954_v20 = vadd.s32 16, %v943_v6  ;;  %v957_v21 = vadd.s32 24, %v943_v6 }
   0x5   :  { %v58_v9 = vsub.s32 %v55_v8, %v943_v6  ;;  %v962_v25 = vadd.s32 32, %v943_v6  ;;  %v965_v27 = vadd.s32 40, %v943_v6  ;;  %v968_v28 = vadd.s32 48, %v943_v6 }
   0x6   :  { %v971_v29 = vadd.s32 56, %v943_v6  ;;  %v976_v32 = vadd.s32 64, %v943_v6  ;;  %v979_v33 = vadd.s32 72, %v943_v6  ;;  %v984_v35 = vadd.s32 80, %v943_v6 }
   0x7   :  { %v59_v10 = vrot.slane %v16_v5, %v58_v9  ;;  %v66_v11 = vrot.slane %v52_v7, %v58_v9  ;;  %v987_v36 = vadd.s32 88, %v943_v6  ;;  %v1000_v39 = vadd.s32 96, %v943_v6 }
   0x8   :  { %v1003_v40 = vadd.s32 104, %v943_v6  ;;  %v1006_v41 = vadd.s32 112, %v943_v6  ;;  %v1027_v49 = vadd.s32 120, %v943_v6 }
   0x9   :  { %v67_v13 = vcombine.high %v59_v10, %v59_v10  ;;  %v75_v14 = vrot.slane %v59_v10, %v58_v9  ;;  %v68_v15 = vcombine.high %v66_v11, %v66_v11  ;;  %v82_v22 = vrot.slane %v66_v11, %v58_v9 }
   0xb   :  { %v89_v16 = vrot.slane %v67_v13, %v58_v9  ;;  %v97_v17 = vcombine.high %v75_v14, %v75_v14  ;;  %v951_v19 = vrot.slane %v75_v14, %v103_v12  ;;  %v96_v26 = vrot.slane %v68_v15, %v58_v9 }
   0xc   :  { %v98_v30 = vcombine.high %v82_v22, %v82_v22  ;;  %v997_v38 = vrot.slane %v82_v22, %v103_v12 }
   0xd   :  { %v99_v23 = vcombine.high %v89_v16, %v89_v16  ;;  %v959_v24 = vrot.slane %v89_v16, %v103_v12  ;;  %v973_v31 = vrot.slane %v97_v17, %v103_v12  ;;  %v100_v34 = vcombine.high %v96_v26, %v96_v26 }
   0xe   :  { %vm133_vm1 = vcmp.eq.s32.totalorder %v943_v6, %v951_v19  ;;  %vm134_vm2 = vcmp.eq.s32.totalorder %v949_v18, %v951_v19  ;;  %v1008_v42 = vrot.slane %v96_v26, %v103_v12  ;;  %v1010_v43 = vrot.slane %v98_v30, %v103_v12 }
   0xf   :  { %v989_v37 = vrot.slane %v99_v23, %v103_v12  ;;  %vm149_vm3 = vcmp.eq.s32.totalorder %v943_v6, %v959_v24  ;;  %vm150_vm4 = vcmp.eq.s32.totalorder %v949_v18, %v959_v24  ;;  %vm165_vm5 = vcmp.eq.s32.totalorder %v943_v6, %v973_v31 }
  0x10   :  { %vm166_vm6 = vcmp.eq.s32.totalorder %v949_v18, %v973_v31  ;;  %v707_v44 = vsel %vm133_vm1, 1.0, %v918_v4  ;;  %v708_v45 = vsel %vm134_vm2, 1.0, %v918_v4  ;;  %v723_v46 = vsel %vm149_vm3, 1.0, %v918_v4 }
  0x11   :  { %v724_v47 = vsel %vm150_vm4, 1.0, %v918_v4  ;;  %v1020_v48 = vrot.slane %v100_v34, %v103_v12  ;;  %vm181_vm7 = vcmp.eq.s32.totalorder %v943_v6, %v989_v37  ;;  %vm182_vm8 = vcmp.eq.s32.totalorder %v949_v18, %v989_v37 }
  0x12   :  { %vm197_vm9 = vcmp.eq.s32.totalorder %v943_v6, %v997_v38  ;;  %vm198_vm10 = vcmp.eq.s32.totalorder %v949_v18, %v997_v38  ;;  %v739_v50 = vsel %vm165_vm5, 1.0, %v918_v4  ;;  %v740_v51 = vsel %vm166_vm6, 1.0, %v918_v4 }
  0x13   :  { %vm213_vm11 = vcmp.eq.s32.totalorder %v943_v6, %v1008_v42  ;;  %vm214_vm12 = vcmp.eq.s32.totalorder %v949_v18, %v1008_v42  ;;  %v517_v52 = vadd.f32 %v723_v46, %v707_v44  ;;  %v524_v53 = vadd.f32 %v724_v47, %v708_v45 }
  0x14   :  { %vm229_vm13 = vcmp.eq.s32.totalorder %v943_v6, %v1010_v43  ;;  %vm230_vm14 = vcmp.eq.s32.totalorder %v949_v18, %v1010_v43  ;;  %v755_v54 = vsel %vm181_vm7, 1.0, %v918_v4  ;;  %v756_v55 = vsel %vm182_vm8, 1.0, %v918_v4 }
  0x15   :  { %vm245_vm15 = vcmp.eq.s32.totalorder %v943_v6, %v1020_v48  ;;  %vm246_vm0 = vcmp.eq.s32.totalorder %v949_v18, %v1020_v48  ;;  %v518_v56 = vadd.f32 %v739_v50, %v517_v52  ;;  %v525_v57 = vadd.f32 %v740_v51, %v524_v53 }
  0x16   :  { %v771_v58 = vsel %vm197_vm9, 1.0, %v918_v4  ;;  %v772_v59 = vsel %vm198_vm10, 1.0, %v918_v4  ;;  %v787_v60 = vsel %vm213_vm11, 1.0, %v918_v4  ;;  %v788_v61 = vsel %vm214_vm12, 1.0, %v918_v4 }
  0x17   :  { %v519_v62 = vadd.f32 %v755_v54, %v518_v56  ;;  %v526_v63 = vadd.f32 %v756_v55, %v525_v57  ;;  %vm135_vm1 = vcmp.eq.s32.totalorder %v954_v20, %v951_v19  ;;  %vm136_vm2 = vcmp.eq.s32.totalorder %v957_v21, %v951_v19 }
  0x18   :  { %v803_v0 = vsel %vm229_vm13, 1.0, %v918_v4  ;;  %v804_v2 = vsel %vm230_vm14, 1.0, %v918_v4  ;;  %vm151_vm3 = vcmp.eq.s32.totalorder %v954_v20, %v959_v24  ;;  %vm152_vm4 = vcmp.eq.s32.totalorder %v957_v21, %v959_v24 }
  0x19   :  { %v819_v3 = vsel %vm245_vm15, 1.0, %v918_v4  ;;  %v820_v5 = vsel %vm246_vm0, 1.0, %v918_v4  ;;  %v520_v7 = vadd.f32 %v771_v58, %v519_v62  ;;  %v527_v8 = vadd.f32 %v772_v59, %v526_v63 }
  0x1a   :  { %vm167_vm5 = vcmp.eq.s32.totalorder %v954_v20, %v973_v31  ;;  %vm168_vm6 = vcmp.eq.s32.totalorder %v957_v21, %v973_v31  ;;  %v709_v9 = vsel %vm135_vm1, 1.0, %v918_v4  ;;  %v710_v10 = vsel %vm136_vm2, 1.0, %v918_v4 }
  0x1b   :  { %v521_v11 = vadd.f32 %v787_v60, %v520_v7  ;;  %v528_v6 = vadd.f32 %v788_v61, %v527_v8  ;;  %v725_v12 = vsel %vm151_vm3, 1.0, %v918_v4  ;;  %v726_v13 = vsel %vm152_vm4, 1.0, %v918_v4 }
  0x1c   :  { %vm183_vm7 = vcmp.eq.s32.totalorder %v954_v20, %v989_v37  ;;  %vm184_vm8 = vcmp.eq.s32.totalorder %v957_v21, %v989_v37  ;;  %vm199_vm9 = vcmp.eq.s32.totalorder %v954_v20, %v997_v38  ;;  %vm200_vm10 = vcmp.eq.s32.totalorder %v957_v21, %v997_v38 }
  0x1d   :  { %v522_v14 = vadd.f32 %v803_v0, %v521_v11  ;;  %v529_v15 = vadd.f32 %v804_v2, %v528_v6  ;;  %v741_v16 = vsel %vm167_vm5, 1.0, %v918_v4  ;;  %v742_v17 = vsel %vm168_vm6, 1.0, %v918_v4 }
  0x1e   :  { %vm215_vm11 = vcmp.eq.s32.totalorder %v954_v20, %v1008_v42  ;;  %vm216_vm12 = vcmp.eq.s32.totalorder %v957_v21, %v1008_v42  ;;  %v531_v18 = vadd.f32 %v725_v12, %v709_v9  ;;  %v538_v22 = vadd.f32 %v726_v13, %v710_v10 }
  0x1f   :  { %v523_v23 = vadd.f32 %v819_v3, %v522_v14  ;;  %v530_v26 = vadd.f32 %v820_v5, %v529_v15  ;;  %v757_v30 = vsel %vm183_vm7, 1.0, %v918_v4  ;;  %v758_v34 = vsel %vm184_vm8, 1.0, %v918_v4 }
  0x20   :  { %vm231_vm13 = vcmp.eq.s32.totalorder %v954_v20, %v1010_v43  ;;  %vm232_vm14 = vcmp.eq.s32.totalorder %v957_v21, %v1010_v43  ;;  %v532_v44 = vadd.f32 %v741_v16, %v531_v18  ;;  %v539_v45 = vadd.f32 %v742_v17, %v538_v22 }
  0x21   :  { %v888_v46 = vpack.c.bf16 %v530_v26, %v523_v23  ;;  %vm247_vm15 = vcmp.eq.s32.totalorder %v954_v20, %v1020_v48  ;;  %v773_v47 = vsel %vm199_vm9, 1.0, %v918_v4  ;;  %v774_v50 = vsel %vm200_vm10, 1.0, %v918_v4 }
  0x22   :  { %vm248_vm0 = vcmp.eq.s32.totalorder %v957_v21, %v1020_v48  ;;  %v789_v51 = vsel %vm215_vm11, 1.0, %v918_v4  ;;  %v533_v52 = vadd.f32 %v757_v30, %v532_v44  ;;  %v540_v53 = vadd.f32 %v758_v34, %v539_v45 }
  0x23   :  { %889 = vmatpush3.bf16.msra.mxu0 %v888_v46  ;;  %v790_v54 = vsel %vm216_vm12, 1.0, %v918_v4  ;;  %v805_v55 = vsel %vm231_vm13, 1.0, %v918_v4  ;;  %vm137_vm1 = vcmp.eq.s32.totalorder %v962_v25, %v951_v19  ;;  %vm153_vm2 = vcmp.eq.s32.totalorder %v962_v25, %v959_v24 }
  0x24   :  { %890 = vmatprep.subr.bf16.mxu0 %v916_v1  ;;  %v534_v56 = vadd.f32 %v773_v47, %v533_v52  ;;  %v541_v57 = vadd.f32 %v774_v50, %v540_v53  ;;  %vm138_vm3 = vcmp.eq.s32.totalorder %v965_v27, %v951_v19  ;;  %vm154_vm4 = vcmp.eq.s32.totalorder %v965_v27, %v959_v24 }
  0x25   :  { %v806_v58 = vsel %vm232_vm14, 1.0, %v918_v4  ;;  %v821_v59 = vsel %vm247_vm15, 1.0, %v918_v4  ;;  %vm169_vm5 = vcmp.eq.s32.totalorder %v962_v25, %v973_v31  ;;  %vm170_vm6 = vcmp.eq.s32.totalorder %v965_v27, %v973_v31 }
  0x26   :  { %v535_v60 = vadd.f32 %v789_v51, %v534_v56  ;;  %v542_v61 = vadd.f32 %v790_v54, %v541_v57  ;;  %v711_v62 = vsel %vm137_vm1, 1.0, %v918_v4  ;;  %v727_v63 = vsel %vm153_vm2, 1.0, %v918_v4 }
  0x27   :  { %v822_v0 = vsel %vm248_vm0, 1.0, %v918_v4  ;;  %vm185_vm7 = vcmp.eq.s32.totalorder %v962_v25, %v989_v37  ;;  %v712_v20 = vsel %vm138_vm3, 1.0, %v918_v4  ;;  %v728_v2 = vsel %vm154_vm4, 1.0, %v918_v4 }
  0x28   :  { %v536_v3 = vadd.f32 %v805_v55, %v535_v60  ;;  %v543_v5 = vadd.f32 %v806_v58, %v542_v61  ;;  %vm186_vm8 = vcmp.eq.s32.totalorder %v965_v27, %v989_v37  ;;  %v743_v7 = vsel %vm169_vm5, 1.0, %v918_v4 }
  0x29   :  { %vm201_vm9 = vcmp.eq.s32.totalorder %v962_v25, %v997_v38  ;;  %vm202_vm10 = vcmp.eq.s32.totalorder %v965_v27, %v997_v38  ;;  %v744_v21 = vsel %vm170_vm6, 1.0, %v918_v4  ;;  %v545_v8 = vadd.f32 %v727_v63, %v711_v62 }
  0x2a   :  { %v537_v9 = vadd.f32 %v821_v59, %v536_v3  ;;  %v544_v10 = vadd.f32 %v822_v0, %v543_v5  ;;  %v759_v11 = vsel %vm185_vm7, 1.0, %v918_v4  ;;  %v552_v6 = vadd.f32 %v728_v2, %v712_v20 }
  0x2b   :  { %vm217_vm11 = vcmp.eq.s32.totalorder %v962_v25, %v1008_v42  ;;  %vm218_vm12 = vcmp.eq.s32.totalorder %v965_v27, %v1008_v42  ;;  %v760_v12 = vsel %vm186_vm8, 1.0, %v918_v4  ;;  %v546_v13 = vadd.f32 %v743_v7, %v545_v8 }
  0x2c   :  { %v891_v14 = vpack.c.bf16 %v544_v10, %v537_v9  ;;  %vm233_vm13 = vcmp.eq.s32.totalorder %v962_v25, %v1010_v43  ;;  %v775_v15 = vsel %vm201_vm9, 1.0, %v918_v4  ;;  %v553_v16 = vadd.f32 %v744_v21, %v552_v6 }
  0x2d   :  { %vm234_vm14 = vcmp.eq.s32.totalorder %v965_v27, %v1010_v43  ;;  %vm249_vm15 = vcmp.eq.s32.totalorder %v962_v25, %v1020_v48  ;;  %v776_v17 = vsel %vm202_vm10, 1.0, %v918_v4  ;;  %v547_v18 = vadd.f32 %v759_v11, %v546_v13 }
  0x2e   :  { %892 = vmatpush3.bf16.msra.mxu0 %v891_v14  ;;  %vm250_vm0 = vcmp.eq.s32.totalorder %v965_v27, %v1020_v48  ;;  %v791_v22 = vsel %vm217_vm11, 1.0, %v918_v4  ;;  %v792_v23 = vsel %vm218_vm12, 1.0, %v918_v4  ;;  %v554_v26 = vadd.f32 %v760_v12, %v553_v16 }
  0x2f   :  { %893 = vmatprep.subr.bf16.mxu0 %v916_v1  ;;  %v807_v30 = vsel %vm233_vm13, 1.0, %v918_v4  ;;  %v548_v34 = vadd.f32 %v775_v15, %v547_v18  ;;  %vm139_vm1 = vcmp.eq.s32.totalorder %v968_v28, %v951_v19  ;;  %vm155_vm2 = vcmp.eq.s32.totalorder %v968_v28, %v959_v24 }
  0x30   :  { %v808_v44 = vsel %vm234_vm14, 1.0, %v918_v4  ;;  %v555_v45 = vadd.f32 %v776_v17, %v554_v26  ;;  %vm140_vm3 = vcmp.eq.s32.totalorder %v971_v29, %v951_v19  ;;  %vm156_vm4 = vcmp.eq.s32.totalorder %v971_v29, %v959_v24 }
  0x31   :  { %v823_v27 = vsel %vm249_vm15, 1.0, %v918_v4  ;;  %v824_v46 = vsel %vm250_vm0, 1.0, %v918_v4  ;;  %v549_v47 = vadd.f32 %v791_v22, %v548_v34  ;;  %vm171_vm5 = vcmp.eq.s32.totalorder %v968_v28, %v973_v31 }
  0x32   :  { %v556_v50 = vadd.f32 %v792_v23, %v555_v45  ;;  %vm172_vm6 = vcmp.eq.s32.totalorder %v971_v29, %v973_v31  ;;  %v713_v51 = vsel %vm139_vm1, 1.0, %v918_v4  ;;  %v729_v52 = vsel %vm155_vm2, 1.0, %v918_v4 }
  0x33   :  { %v550_v53 = vadd.f32 %v807_v30, %v549_v47  ;;  %vm187_vm7 = vcmp.eq.s32.totalorder %v968_v28, %v989_v37  ;;  %v714_v25 = vsel %vm140_vm3, 1.0, %v918_v4  ;;  %v730_v54 = vsel %vm156_vm4, 1.0, %v918_v4 }
  0x34   :  { %v557_v55 = vadd.f32 %v808_v44, %v556_v50  ;;  %vm188_vm8 = vcmp.eq.s32.totalorder %v971_v29, %v989_v37  ;;  %vm203_vm9 = vcmp.eq.s32.totalorder %v968_v28, %v997_v38  ;;  %v745_v56 = vsel %vm171_vm5, 1.0, %v918_v4 }
  0x35   :  { %v551_v57 = vadd.f32 %v823_v27, %v550_v53  ;;  %vm204_vm10 = vcmp.eq.s32.totalorder %v971_v29, %v997_v38  ;;  %v746_v58 = vsel %vm172_vm6, 1.0, %v918_v4  ;;  %v559_v59 = vadd.f32 %v729_v52, %v713_v51 }
  0x36   :  { %v558_v60 = vadd.f32 %v824_v46, %v557_v55  ;;  %vm219_vm11 = vcmp.eq.s32.totalorder %v968_v28, %v1008_v42  ;;  %v761_v61 = vsel %vm187_vm7, 1.0, %v918_v4  ;;  %v566_v62 = vadd.f32 %v730_v54, %v714_v25 }
  0x37   :  { %vm220_vm12 = vcmp.eq.s32.totalorder %v971_v29, %v1008_v42  ;;  %vm235_vm13 = vcmp.eq.s32.totalorder %v968_v28, %v1010_v43  ;;  %v762_v63 = vsel %vm188_vm8, 1.0, %v918_v4  ;;  %v560_v0 = vadd.f32 %v745_v56, %v559_v59 }
  0x38   :  { %v894_v20 = vpack.c.bf16 %v558_v60, %v551_v57  ;;  %vm236_vm14 = vcmp.eq.s32.totalorder %v971_v29, %v1010_v43  ;;  %v777_v2 = vsel %vm203_vm9, 1.0, %v918_v4  ;;  %v567_v3 = vadd.f32 %v746_v58, %v566_v62 }
  0x39   :  { %vm251_vm15 = vcmp.eq.s32.totalorder %v968_v28, %v1020_v48  ;;  %vm252_vm0 = vcmp.eq.s32.totalorder %v971_v29, %v1020_v48  ;;  %v778_v5 = vsel %vm204_vm10, 1.0, %v918_v4  ;;  %v561_v7 = vadd.f32 %v761_v61, %v560_v0 }
  0x3a   :  { %895 = vmatpush3.bf16.msra.mxu0 %v894_v20  ;;  %v793_v21 = vsel %vm219_vm11, 1.0, %v918_v4  ;;  %v794_v8 = vsel %vm220_vm12, 1.0, %v918_v4  ;;  %v568_v9 = vadd.f32 %v762_v63, %v567_v3  ;;  %vm141_vm1 = vcmp.eq.s32.totalorder %v976_v32, %v951_v19 }
  0x3b   :  { %896 = vmatprep.subr.bf16.mxu0 %v916_v1  ;;  %v562_v10 = vadd.f32 %v777_v2, %v561_v7  ;;  %vm142_vm2 = vcmp.eq.s32.totalorder %v979_v33, %v951_v19  ;;  %vm157_vm3 = vcmp.eq.s32.totalorder %v976_v32, %v959_v24  ;;  %vm158_vm4 = vcmp.eq.s32.totalorder %v979_v33, %v959_v24 }
  0x3c   :  { %v809_v11 = vsel %vm235_vm13, 1.0, %v918_v4  ;;  %v810_v6 = vsel %vm236_vm14, 1.0, %v918_v4  ;;  %v825_v12 = vsel %vm251_vm15, 1.0, %v918_v4  ;;  %v569_v13 = vadd.f32 %v778_v5, %v568_v9 }
  0x3d   :  { %v563_v14 = vadd.f32 %v793_v21, %v562_v10  ;;  %vm173_vm5 = vcmp.eq.s32.totalorder %v976_v32, %v973_v31  ;;  %vm174_vm6 = vcmp.eq.s32.totalorder %v979_v33, %v973_v31  ;;  %v715_v15 = vsel %vm141_vm1, 1.0, %v918_v4 }
  0x3e   :  { %v570_v16 = vadd.f32 %v794_v8, %v569_v13  ;;  %v716_v17 = vsel %vm142_vm2, 1.0, %v918_v4  ;;  %v731_v18 = vsel %vm157_vm3, 1.0, %v918_v4  ;;  %v732_v22 = vsel %vm158_vm4, 1.0, %v918_v4 }
  0x3f   :  { %v826_v28 = vsel %vm252_vm0, 1.0, %v918_v4  ;;  %v564_v23 = vadd.f32 %v809_v11, %v563_v14  ;;  %vm189_vm7 = vcmp.eq.s32.totalorder %v976_v32, %v989_v37  ;;  %vm190_vm8 = vcmp.eq.s32.totalorder %v979_v33, %v989_v37 }
  0x40   :  { %v571_v26 = vadd.f32 %v810_v6, %v570_v16  ;;  %vm205_vm9 = vcmp.eq.s32.totalorder %v976_v32, %v997_v38  ;;  %v747_v30 = vsel %vm173_vm5, 1.0, %v918_v4  ;;  %v748_v34 = vsel %vm174_vm6, 1.0, %v918_v4 }
  0x41   :  { %v565_v44 = vadd.f32 %v825_v12, %v564_v23  ;;  %vm206_vm10 = vcmp.eq.s32.totalorder %v979_v33, %v997_v38  ;;  %v573_v29 = vadd.f32 %v731_v18, %v715_v15  ;;  %v580_v45 = vadd.f32 %v732_v22, %v716_v17 }
  0x42   :  { %v572_v27 = vadd.f32 %v826_v28, %v571_v26  ;;  %vm221_vm11 = vcmp.eq.s32.totalorder %v976_v32, %v1008_v42  ;;  %v763_v46 = vsel %vm189_vm7, 1.0, %v918_v4  ;;  %v764_v47 = vsel %vm190_vm8, 1.0, %v918_v4 }
  0x43   :  { %vm222_vm12 = vcmp.eq.s32.totalorder %v979_v33, %v1008_v42  ;;  %vm237_vm13 = vcmp.eq.s32.totalorder %v976_v32, %v1010_v43  ;;  %v574_v50 = vadd.f32 %v747_v30, %v573_v29  ;;  %v581_v51 = vadd.f32 %v748_v34, %v580_v45 }
  0x44   :  { %v897_v52 = vpack.c.bf16 %v572_v27, %v565_v44  ;;  %vm238_vm14 = vcmp.eq.s32.totalorder %v979_v33, %v1010_v43  ;;  %v779_v53 = vsel %vm205_vm9, 1.0, %v918_v4  ;;  %v780_v25 = vsel %vm206_vm10, 1.0, %v918_v4 }
  0x45   :  { %vm253_vm15 = vcmp.eq.s32.totalorder %v976_v32, %v1020_v48  ;;  %vm254_vm0 = vcmp.eq.s32.totalorder %v979_v33, %v1020_v48  ;;  %v575_v54 = vadd.f32 %v763_v46, %v574_v50  ;;  %v582_v55 = vadd.f32 %v764_v47, %v581_v51 }
  0x46   :  { %898 = vmatpush3.bf16.msra.mxu0 %v897_v52  ;;  %v795_v56 = vsel %vm221_vm11, 1.0, %v918_v4  ;;  %v796_v57 = vsel %vm222_vm12, 1.0, %v918_v4  ;;  %vm143_vm1 = vcmp.eq.s32.totalorder %v984_v35, %v951_v19  ;;  %vm144_vm2 = vcmp.eq.s32.totalorder %v987_v36, %v951_v19 }
  0x47   :  { %899 = vmatprep.subr.bf16.mxu0 %v916_v1  ;;  %v576_v58 = vadd.f32 %v779_v53, %v575_v54  ;;  %v583_v59 = vadd.f32 %v780_v25, %v582_v55  ;;  %vm159_vm3 = vcmp.eq.s32.totalorder %v984_v35, %v959_v24  ;;  %vm160_vm4 = vcmp.eq.s32.totalorder %v987_v36, %v959_v24 }
  0x48   :  { %v811_v60 = vsel %vm237_vm13, 1.0, %v918_v4  ;;  %v812_v61 = vsel %vm238_vm14, 1.0, %v918_v4  ;;  %v827_v62 = vsel %vm253_vm15, 1.0, %v918_v4  ;;  %v828_v63 = vsel %vm254_vm0, 1.0, %v918_v4 }
  0x49   :  { %v577_v0 = vadd.f32 %v795_v56, %v576_v58  ;;  %v584_v20 = vadd.f32 %v796_v57, %v583_v59  ;;  %vm175_vm5 = vcmp.eq.s32.totalorder %v984_v35, %v973_v31  ;;  %vm176_vm6 = vcmp.eq.s32.totalorder %v987_v36, %v973_v31 }
  0x4a   :  { %v717_v2 = vsel %vm143_vm1, 1.0, %v918_v4  ;;  %v718_v3 = vsel %vm144_vm2, 1.0, %v918_v4  ;;  %v733_v32 = vsel %vm159_vm3, 1.0, %v918_v4  ;;  %v734_v5 = vsel %vm160_vm4, 1.0, %v918_v4 }
  0x4b   :  { %v578_v7 = vadd.f32 %v811_v60, %v577_v0  ;;  %v585_v21 = vadd.f32 %v812_v61, %v584_v20  ;;  %vm191_vm7 = vcmp.eq.s32.totalorder %v984_v35, %v989_v37  ;;  %vm192_vm8 = vcmp.eq.s32.totalorder %v987_v36, %v989_v37 }
  0x4c   :  { %vm207_vm9 = vcmp.eq.s32.totalorder %v984_v35, %v997_v38  ;;  %vm208_vm10 = vcmp.eq.s32.totalorder %v987_v36, %v997_v38  ;;  %v749_v33 = vsel %vm175_vm5, 1.0, %v918_v4  ;;  %v750_v8 = vsel %vm176_vm6, 1.0, %v918_v4 }
  0x4d   :  { %v579_v9 = vadd.f32 %v827_v62, %v578_v7  ;;  %v586_v10 = vadd.f32 %v828_v63, %v585_v21  ;;  %v587_v11 = vadd.f32 %v733_v32, %v717_v2  ;;  %v594_v6 = vadd.f32 %v734_v5, %v718_v3 }
  0x4e   :  { %vm223_vm11 = vcmp.eq.s32.totalorder %v984_v35, %v1008_v42  ;;  %vm224_vm12 = vcmp.eq.s32.totalorder %v987_v36, %v1008_v42  ;;  %v765_v12 = vsel %vm191_vm7, 1.0, %v918_v4  ;;  %v766_v13 = vsel %vm192_vm8, 1.0, %v918_v4 }
  0x4f   :  { %v900_v14 = vpack.c.bf16 %v586_v10, %v579_v9  ;;  %vm239_vm13 = vcmp.eq.s32.totalorder %v984_v35, %v1010_v43  ;;  %v588_v15 = vadd.f32 %v749_v33, %v587_v11  ;;  %v595_v16 = vadd.f32 %v750_v8, %v594_v6 }
  0x50   :  { %vm240_vm14 = vcmp.eq.s32.totalorder %v987_v36, %v1010_v43  ;;  %vm255_vm15 = vcmp.eq.s32.totalorder %v984_v35, %v1020_v48  ;;  %v781_v17 = vsel %vm207_vm9, 1.0, %v918_v4  ;;  %v782_v18 = vsel %vm208_vm10, 1.0, %v918_v4 }
  0x51   :  { %901 = vmatpush3.bf16.msra.mxu0 %v900_v14  ;;  %vm256_vm0 = vcmp.eq.s32.totalorder %v987_v36, %v1020_v48  ;;  %v797_v22 = vsel %vm223_vm11, 1.0, %v918_v4  ;;  %v589_v28 = vadd.f32 %v765_v12, %v588_v15  ;;  %v596_v23 = vadd.f32 %v766_v13, %v595_v16 }
  0x52   :  { %902 = vmatprep.subr.bf16.mxu0 %v916_v1  ;;  %v798_v26 = vsel %vm224_vm12, 1.0, %v918_v4  ;;  %v813_v30 = vsel %vm239_vm13, 1.0, %v918_v4  ;;  %vm145_vm1 = vcmp.eq.s32.totalorder %v1000_v39, %v951_v19  ;;  %vm161_vm2 = vcmp.eq.s32.totalorder %v1000_v39, %v959_v24 }
  0x53   :  { %v590_v34 = vadd.f32 %v781_v17, %v589_v28  ;;  %v597_v44 = vadd.f32 %v782_v18, %v596_v23  ;;  %vm146_vm3 = vcmp.eq.s32.totalorder %v1003_v40, %v951_v19  ;;  %vm162_vm4 = vcmp.eq.s32.totalorder %v1003_v40, %v959_v24 }
  0x54   :  { %v814_v29 = vsel %vm240_vm14, 1.0, %v918_v4  ;;  %v829_v45 = vsel %vm255_vm15, 1.0, %v918_v4  ;;  %vm177_vm5 = vcmp.eq.s32.totalorder %v1000_v39, %v973_v31  ;;  %vm178_vm6 = vcmp.eq.s32.totalorder %v1003_v40, %v973_v31 }
  0x55   :  { %v591_v27 = vadd.f32 %v797_v22, %v590_v34  ;;  %v598_v46 = vadd.f32 %v798_v26, %v597_v44  ;;  %v719_v47 = vsel %vm145_vm1, 1.0, %v918_v4  ;;  %v735_v50 = vsel %vm161_vm2, 1.0, %v918_v4 }
  0x56   :  { %v830_v51 = vsel %vm256_vm0, 1.0, %v918_v4  ;;  %vm193_vm7 = vcmp.eq.s32.totalorder %v1000_v39, %v989_v37  ;;  %v720_v35 = vsel %vm146_vm3, 1.0, %v918_v4  ;;  %v736_v52 = vsel %vm162_vm4, 1.0, %v918_v4 }
  0x57   :  { %v592_v53 = vadd.f32 %v813_v30, %v591_v27  ;;  %v599_v25 = vadd.f32 %v814_v29, %v598_v46  ;;  %vm194_vm8 = vcmp.eq.s32.totalorder %v1003_v40, %v989_v37  ;;  %v751_v54 = vsel %vm177_vm5, 1.0, %v918_v4 }
  0x58   :  { %vm209_vm9 = vcmp.eq.s32.totalorder %v1000_v39, %v997_v38  ;;  %vm210_vm10 = vcmp.eq.s32.totalorder %v1003_v40, %v997_v38  ;;  %v752_v36 = vsel %vm178_vm6, 1.0, %v918_v4  ;;  %v601_v55 = vadd.f32 %v735_v50, %v719_v47 }
  0x59   :  { %v593_v56 = vadd.f32 %v829_v45, %v592_v53  ;;  %v600_v57 = vadd.f32 %v830_v51, %v599_v25  ;;  %v767_v58 = vsel %vm193_vm7, 1.0, %v918_v4  ;;  %v608_v59 = vadd.f32 %v736_v52, %v720_v35 }
  0x5a   :  { %vm225_vm11 = vcmp.eq.s32.totalorder %v1000_v39, %v1008_v42  ;;  %vm226_vm12 = vcmp.eq.s32.totalorder %v1003_v40, %v1008_v42  ;;  %v768_v60 = vsel %vm194_vm8, 1.0, %v918_v4  ;;  %v602_v61 = vadd.f32 %v751_v54, %v601_v55 }
  0x5b   :  { %v903_v62 = vpack.c.bf16 %v600_v57, %v593_v56  ;;  %vm241_vm13 = vcmp.eq.s32.totalorder %v1000_v39, %v1010_v43  ;;  %v783_v63 = vsel %vm209_vm9, 1.0, %v918_v4  ;;  %v609_v0 = vadd.f32 %v752_v36, %v608_v59 }
  0x5c   :  { %vm242_vm14 = vcmp.eq.s32.totalorder %v1003_v40, %v1010_v43  ;;  %vm257_vm15 = vcmp.eq.s32.totalorder %v1000_v39, %v1020_v48  ;;  %v784_v20 = vsel %vm210_vm10, 1.0, %v918_v4  ;;  %v603_v2 = vadd.f32 %v767_v58, %v602_v61 }
  0x5d   :  { %904 = vmatpush3.bf16.msra.mxu0 %v903_v62  ;;  %vm258_vm0 = vcmp.eq.s32.totalorder %v1003_v40, %v1020_v48  ;;  %v799_v3 = vsel %vm225_vm11, 1.0, %v918_v4  ;;  %v800_v32 = vsel %vm226_vm12, 1.0, %v918_v4  ;;  %v610_v5 = vadd.f32 %v768_v60, %v609_v0 }
  0x5e   :  { %905 = vmatprep.subr.bf16.mxu0 %v916_v1  ;;  %v815_v7 = vsel %vm241_vm13, 1.0, %v918_v4  ;;  %v604_v21 = vadd.f32 %v783_v63, %v603_v2  ;;  %vm147_vm1 = vcmp.eq.s32.totalorder %v1006_v41, %v951_v19  ;;  %vm163_vm2 = vcmp.eq.s32.totalorder %v1006_v41, %v959_v24 }
  0x5f   :  { %v816_v33 = vsel %vm242_vm14, 1.0, %v918_v4  ;;  %v611_v8 = vadd.f32 %v784_v20, %v610_v5  ;;  %vm148_vm3 = vcmp.eq.s32.totalorder %v1027_v49, %v951_v19  ;;  %vm164_vm4 = vcmp.eq.s32.totalorder %v1027_v49, %v959_v24 }
  0x60   :  { %v831_v40 = vsel %vm257_vm15, 1.0, %v918_v4  ;;  %v832_v9 = vsel %vm258_vm0, 1.0, %v918_v4  ;;  %v605_v10 = vadd.f32 %v799_v3, %v604_v21  ;;  %vm179_vm5 = vcmp.eq.s32.totalorder %v1006_v41, %v973_v31 }
  0x61   :  { %v612_v11 = vadd.f32 %v800_v32, %v611_v8  ;;  %vm180_vm6 = vcmp.eq.s32.totalorder %v1027_v49, %v973_v31  ;;  %v721_v19 = vsel %vm147_vm1, 1.0, %v918_v4  ;;  %v737_v6 = vsel %vm163_vm2, 1.0, %v918_v4 }
  0x62   :  { %v606_v24 = vadd.f32 %v815_v7, %v605_v10  ;;  %vm195_vm7 = vcmp.eq.s32.totalorder %v1006_v41, %v989_v37  ;;  %v722_v39 = vsel %vm148_vm3, 1.0, %v918_v4  ;;  %v738_v12 = vsel %vm164_vm4, 1.0, %v918_v4 }
  0x63   :  { %v613_v13 = vadd.f32 %v816_v33, %v612_v11  ;;  %vm196_vm8 = vcmp.eq.s32.totalorder %v1027_v49, %v989_v37  ;;  %v753_v14 = vsel %vm179_vm5, 1.0, %v918_v4  ;;  %vm211_vm9 = vcmp.eq.s32.totalorder %v1006_v41, %v997_v38 }
  0x64   :  { %v607_v15 = vadd.f32 %v831_v40, %v606_v24  ;;  %v754_v31 = vsel %vm180_vm6, 1.0, %v918_v4  ;;  %v615_v16 = vadd.f32 %v737_v6, %v721_v19  ;;  %vm212_vm10 = vcmp.eq.s32.totalorder %v1027_v49, %v997_v38 }
  0x65   :  { %v614_v17 = vadd.f32 %v832_v9, %v613_v13  ;;  %v769_v18 = vsel %vm195_vm7, 1.0, %v918_v4  ;;  %v622_v22 = vadd.f32 %v738_v12, %v722_v39  ;;  %vm227_vm11 = vcmp.eq.s32.totalorder %v1006_v41, %v1008_v42 }
  0x66   :  { %v770_v37 = vsel %vm196_vm8, 1.0, %v918_v4  ;;  %v616_v28 = vadd.f32 %v753_v14, %v615_v16  ;;  %vm228_vm12 = vcmp.eq.s32.totalorder %v1027_v49, %v1008_v42  ;;  %v785_v26 = vsel %vm211_vm9, 1.0, %v918_v4 }
  0x67   :  { %v906_v23 = vpack.c.bf16 %v614_v17, %v607_v15  ;;  %v623_v30 = vadd.f32 %v754_v31, %v622_v22  ;;  %vm243_vm13 = vcmp.eq.s32.totalorder %v1006_v41, %v1010_v43  ;;  %v786_v38 = vsel %vm212_vm10, 1.0, %v918_v4 }
  0x68   :  { %v617_v34 = vadd.f32 %v769_v18, %v616_v28  ;;  %vm244_vm14 = vcmp.eq.s32.totalorder %v1027_v49, %v1010_v43  ;;  %v801_v44 = vsel %vm227_vm11, 1.0, %v918_v4  ;;  %vm259_vm15 = vcmp.eq.s32.totalorder %v1006_v41, %v1020_v48 }
  0x69   :  { %907 = vmatpush3.bf16.msra.mxu0 %v906_v23  ;;  %v624_v29 = vadd.f32 %v770_v37, %v623_v30  ;;  %v802_v42 = vsel %vm228_vm12, 1.0, %v918_v4  ;;  %vm260_vm0 = vcmp.eq.s32.totalorder %v1027_v49, %v1020_v48  ;;  %v817_v27 = vsel %vm243_vm13, 1.0, %v918_v4  ;;  %v630_v48 = vld [vmem:[%s1519_s1] sm:$0x1] }
  0x6a   :  { %908 = vmatprep.subr.bf16.mxu0 %v916_v1  ;;  %v618_v45 = vadd.f32 %v785_v26, %v617_v34  ;;  %v818_v47 = vsel %vm244_vm14, 1.0, %v918_v4  ;;  %v833_v50 = vsel %vm259_vm15, 1.0, %v918_v4  ;;  %v834_v1 = vsel %vm260_vm0, 1.0, %v918_v4  ;;  %v629_v49 = vld [vmem:[%s1518_s2] sm:$0x1] }
  0x6b   :  { %v625_v46 = vadd.f32 %v786_v38, %v624_v29 }
  0x6c   :  { %v619_v43 = vadd.f32 %v801_v44, %v618_v45 }
  0x6d   :  { %v626_v51 = vadd.f32 %v802_v42, %v625_v46 }
  0x6e   :  { %v620_v35 = vadd.f32 %v817_v27, %v619_v43 }
  0x6f   :  { %v627_v52 = vadd.f32 %v818_v47, %v626_v51 }
  0x70   :  { %v621_v41 = vadd.f32 %v833_v50, %v620_v35 }
  0x71   :  { %v628_v53 = vadd.f32 %v834_v1, %v627_v52 }
  0x73   :  { %v909_v25 = vpack.c.bf16 %v628_v53, %v621_v41 }
  0x75   :  { %910 = vmatpush3.bf16.msra.mxu0 %v909_v25 }
  0x78   :  { %885 = vmatmul.mubr.f32.vlgmr.msra.gmra.mrb[0].mxu0 %v630_v48 }
 0x14b   :  { %v697_v54 = vpop.f32.mrb[0].mxu0 }
 0x14c   :  { %v701_v36 = vadd.f32 %v697_v54, %v629_v49  ;;  %v886_v55 = vpop.f32.mrb[1].mxu0 }
 0x14e   :  { %702 = vst [vmem:[%s1518_s2] sm:$0x1] %v701_v36 }

</bundles_post_ra>
